<compile_context>
chip_gen: v6e
topology: v6e:2x2x1
jax: 0.10.0
libtpu: 0.0.40
codegen_flags: <defaults>
</compile_context>

<pallas_src>
import functools

import numpy as np
import jax
import jax.numpy as jnp
from jax import lax
from jax.experimental import pallas as pl
from jax.experimental.pallas import tpu as pltpu


def _contract_kernel(perm_ref, x_ref, o_ref, *, s, W, Ws, compute_dtype,
                     precision):
    """One grid step: one image x one block of TR (c,hs) rows.

    perm_ref: (W, W)            shared 0/1 lane-permutation block (VMEM)
    x_ref:    (1, TR, s*W)      input-view block
    o_ref:    (1, s*s, TR, Ws)  output-view block
    """
    perm = perm_ref[...]
    for sh in range(s):                                    # tiny static unroll
        lhs = x_ref[0, :, sh * W:(sh + 1) * W].astype(compute_dtype)  # (TR, W)
        # Exact lane shuffle: every column of `perm` has exactly one 1.0.
        y = jnp.dot(lhs, perm, preferred_element_type=jnp.float32,
                    precision=precision)                              # (TR, W)
        for sw in range(s):
            o_ref[0, sh * s + sw] = (
                y[:, sw * Ws:(sw + 1) * Ws].astype(o_ref.dtype))


def contract(x, gain=2, *, row_block=None, vmem_budget=12 << 20):
    """Pallas implementation of Contract.forward for NCHW input."""
    N, C, H, W = x.shape
    s = int(gain)
    if s == 1:
        return x
    assert H % s == 0 and W % s == 0, "H and W must be divisible by gain"
    Hs, Ws = H // s, W // s
    SW = s * W            # combined (sh, w) lane extent of the input view
    R = C * Hs            # combined (c, hs) row extent
    itemsize = jnp.dtype(x.dtype).itemsize

    # Dtype-dependent MXU path (all exact for a 0/1 permutation).
    if x.dtype == jnp.bfloat16:
        compute_dtype, precision = jnp.bfloat16, None          # full-rate MXU
    elif jnp.issubdtype(x.dtype, jnp.floating):
        compute_dtype, precision = jnp.float32, lax.Precision.HIGHEST
    else:
        # TODO(synk): integer dtypes need a non-MXU lane-permute path (the v7x
        # MXU has no integer mode; the f32 path is only exact below 2**24).
        raise NotImplementedError("Contract kernel supports float dtypes only")

    # Free (row-major bitcast) input view:
    #   x_v[n, c*Hs + hs, sh*W + w] = x[n, c, hs*s + sh, w]
    x_v = x.reshape(N, R, SW)

    # Shared W x W 0/1 block of the block-diagonal lane permutation, built with
    # numpy at trace time: input lane w = ws*s + sw  ->  lane sw*Ws + ws.
    w_idx = np.arange(W)
    tgt = (w_idx % s) * Ws + (w_idx // s)
    perm_np = np.zeros((W, W), dtype=np.float32)
    perm_np[w_idx, tgt] = 1.0
    perm = jnp.asarray(perm_np, dtype=compute_dtype)

    # Row blocking: budget counts double-buffered input + output blocks, the
    # (double-buffered) perm matrix and the in-kernel f32 temporaries.
    if row_block is None:
        perm_bytes = 2 * W * W * jnp.dtype(compute_dtype).itemsize
        per_row = 4 * SW * itemsize + 3 * W * 4
        avail = max(vmem_budget - perm_bytes, 2 << 20)
        row_block = max(1, avail // per_row)
    row_block = int(row_block)
    if row_block >= R:
        TR = R
    else:
        TR = max(32, (row_block // 32) * 32)   # multiple of native sublane tile
        if TR >= R:
            TR = R
    grid = (N, pl.cdiv(R, TR))

    kernel = functools.partial(_contract_kernel, s=s, W=W, Ws=Ws,
                               compute_dtype=compute_dtype, precision=precision)

    cost = pl.CostEstimate(
        flops=int(2 * N * s * R * W * W),
        transcendentals=0,
        bytes_accessed=int(2 * N * C * H * W * itemsize + W * W * itemsize))

    out_v = pl.pallas_call(
        kernel,
        out_shape=jax.ShapeDtypeStruct((N, s * s, R, Ws), x.dtype),
        grid_spec=pltpu.PrefetchScalarGridSpec(
            num_scalar_prefetch=0,
            grid=grid,
            in_specs=[
                pl.BlockSpec((W, W), lambda n, r: (0, 0)),           # perm
                pl.BlockSpec((1, TR, SW), lambda n, r: (n, r, 0)),   # input
            ],
            out_specs=pl.BlockSpec((1, s * s, TR, Ws),
                                   lambda n, r: (n, 0, r, 0)),
        ),
        compiler_params=pltpu.CompilerParams(
            dimension_semantics=("parallel", "parallel"),
            vmem_limit_bytes=32 << 20),
        cost_estimate=cost,
    )(perm, x_v)

    # Free bitcast back to the PyTorch output layout.
    return out_v.reshape(N, C * s * s, Hs, Ws)


def _reference(x, s):
    N, C, H, W = x.shape
    y = x.reshape(N, C, H // s, s, W // s, s)
    y = jnp.transpose(y, (0, 3, 5, 1, 2, 4))
    return y.reshape(N, C * s * s, H // s, W // s)


if __name__ == "__main__":
    # Case 1: nominal small shape, float32.
    N, C, H, W = 2, 4, 16, 16
    gain = 2
    x = jax.random.normal(jax.random.PRNGKey(0), (N, C, H, W), dtype=jnp.float32)
    out = jax.block_until_ready(contract(x, gain=gain))
    ref = _reference(x, gain)
    assert out.shape == (N, C * gain * gain, H // gain, W // gain)
    assert jnp.allclose(out, ref, atol=1e-6, rtol=1e-6), "f32 mismatch"

    # Case 2: bfloat16 path + forced row blocking with a partial last block.
    x2 = jax.random.normal(jax.random.PRNGKey(1), (1, 3, 32, 16),
                           dtype=jnp.bfloat16)
    out2 = jax.block_until_ready(contract(x2, gain=2, row_block=32))
    ref2 = _reference(x2, 2)
    assert out2.shape == ref2.shape
    assert jnp.allclose(out2.astype(jnp.float32), ref2.astype(jnp.float32),
                        atol=1e-6, rtol=1e-6), "bf16 / row-blocked mismatch"

    print("KERNEL_OK")
</pallas_src>

<mosaic_0001>
module attributes {stable_mosaic.version = 11 : i64} {
  func.func @_contract_kernel(%arg0: i32, %arg1: i32, %arg2: memref<16x16xf32, #tpu.memory_space<vmem>>, %arg3: memref<1x32x32xf32, #tpu.memory_space<vmem>>, %arg4: memref<1x4x32x8xf32, #tpu.memory_space<vmem>>) attributes {dimension_semantics = [#tpu.dimension_semantics<parallel>, #tpu.dimension_semantics<parallel>], iteration_bounds = array<i64: 2, 1>, scalar_prefetch = 0 : i64, scratch_operands = 0 : i64, tpu.core_type = #tpu.core_type<tc>, window_params = [{pipeline_mode = #tpu.pipeline_mode<synchronous>, transform_indices = @transform_0, window_bounds = array<i64: 16, 16>}, {transform_indices = @transform_1, window_bounds = array<i64: 1, 32, 32>}, {transform_indices = @transform_2, window_bounds = array<i64: 1, 4, 32, 8>}]} {
    %c0 = arith.constant 0 : index
    %c0_0 = arith.constant 0 : index
    %0 = vector.load %arg2[%c0, %c0_0] : memref<16x16xf32, #tpu.memory_space<vmem>>, vector<16x16xf32>
    %c0_1 = arith.constant 0 : index
    %c0_2 = arith.constant 0 : index
    %c0_3 = arith.constant 0 : index
    %1 = vector.load %arg3[%c0_1, %c0_2, %c0_3] : memref<1x32x32xf32, #tpu.memory_space<vmem>>, vector<1x32x16xf32>
    %2 = vector.shape_cast %1 : vector<1x32x16xf32> to vector<32x16xf32>
    %cst = arith.constant dense<0.000000e+00> : vector<32x16xf32>
    %3 = tpu.matmul %2, %0, %cst {dimension_numbers = #tpu.dot_dimension_numbers<[1], [0], [0], [1], [0, 0, 1, 1], [], []>, precision = #tpu.contract_precision<fp32>} : vector<32x16xf32>, vector<16x16xf32>, vector<32x16xf32> -> vector<32x16xf32>
    %4 = vector.extract_strided_slice %3 {offsets = [0, 0], sizes = [32, 8], strides = [1, 1]} : vector<32x16xf32> to vector<32x8xf32>
    %c0_4 = arith.constant 0 : index
    %c0_5 = arith.constant 0 : index
    %c0_6 = arith.constant 0 : index
    %c0_7 = arith.constant 0 : index
    %5 = vector.load %arg4[%c0_4, %c0_5, %c0_6, %c0_7] : memref<1x4x32x8xf32, #tpu.memory_space<vmem>>, vector<1x1x32x8xf32>
    %6 = vector.shape_cast %5 : vector<1x1x32x8xf32> to vector<32x8xf32>
    %7 = vector.shape_cast %4 : vector<32x8xf32> to vector<1x1x32x8xf32>
    tpu.vector_store %arg4[%c0_4, %c0_5, %c0_6, %c0_7], %7 {strides = array<i32>} : memref<1x4x32x8xf32, #tpu.memory_space<vmem>>, vector<1x1x32x8xf32>,
    %8 = vector.extract_strided_slice %3 {offsets = [0, 8], sizes = [32, 8], strides = [1, 1]} : vector<32x16xf32> to vector<32x8xf32>
    %c0_8 = arith.constant 0 : index
    %c1 = arith.constant 1 : index
    %c0_9 = arith.constant 0 : index
    %c0_10 = arith.constant 0 : index
    %9 = vector.load %arg4[%c0_8, %c1, %c0_9, %c0_10] : memref<1x4x32x8xf32, #tpu.memory_space<vmem>>, vector<1x1x32x8xf32>
    %10 = vector.shape_cast %9 : vector<1x1x32x8xf32> to vector<32x8xf32>
    %11 = vector.shape_cast %8 : vector<32x8xf32> to vector<1x1x32x8xf32>
    tpu.vector_store %arg4[%c0_8, %c1, %c0_9, %c0_10], %11 {strides = array<i32>} : memref<1x4x32x8xf32, #tpu.memory_space<vmem>>, vector<1x1x32x8xf32>,
    %c0_11 = arith.constant 0 : index
    %c0_12 = arith.constant 0 : index
    %c16 = arith.constant 16 : index
    %12 = vector.load %arg3[%c0_11, %c0_12, %c16] : memref<1x32x32xf32, #tpu.memory_space<vmem>>, vector<1x32x16xf32>
    %13 = vector.shape_cast %12 : vector<1x32x16xf32> to vector<32x16xf32>
    %cst_13 = arith.constant dense<0.000000e+00> : vector<32x16xf32>
    %14 = tpu.matmul %13, %0, %cst_13 {dimension_numbers = #tpu.dot_dimension_numbers<[1], [0], [0], [1], [0, 0, 1, 1], [], []>, precision = #tpu.contract_precision<fp32>} : vector<32x16xf32>, vector<16x16xf32>, vector<32x16xf32> -> vector<32x16xf32>
    %15 = vector.extract_strided_slice %14 {offsets = [0, 0], sizes = [32, 8], strides = [1, 1]} : vector<32x16xf32> to vector<32x8xf32>
    %c0_14 = arith.constant 0 : index
    %c2 = arith.constant 2 : index
    %c0_15 = arith.constant 0 : index
    %c0_16 = arith.constant 0 : index
    %16 = vector.load %arg4[%c0_14, %c2, %c0_15, %c0_16] : memref<1x4x32x8xf32, #tpu.memory_space<vmem>>, vector<1x1x32x8xf32>
    %17 = vector.shape_cast %16 : vector<1x1x32x8xf32> to vector<32x8xf32>
    %18 = vector.shape_cast %15 : vector<32x8xf32> to vector<1x1x32x8xf32>
    tpu.vector_store %arg4[%c0_14, %c2, %c0_15, %c0_16], %18 {strides = array<i32>} : memref<1x4x32x8xf32, #tpu.memory_space<vmem>>, vector<1x1x32x8xf32>,
    %19 = vector.extract_strided_slice %14 {offsets = [0, 8], sizes = [32, 8], strides = [1, 1]} : vector<32x16xf32> to vector<32x8xf32>
    %c0_17 = arith.constant 0 : index
    %c3 = arith.constant 3 : index
    %c0_18 = arith.constant 0 : index
    %c0_19 = arith.constant 0 : index
    %20 = vector.load %arg4[%c0_17, %c3, %c0_18, %c0_19] : memref<1x4x32x8xf32, #tpu.memory_space<vmem>>, vector<1x1x32x8xf32>
    %21 = vector.shape_cast %20 : vector<1x1x32x8xf32> to vector<32x8xf32>
    %22 = vector.shape_cast %19 : vector<32x8xf32> to vector<1x1x32x8xf32>
    tpu.vector_store %arg4[%c0_17, %c3, %c0_18, %c0_19], %22 {strides = array<i32>} : memref<1x4x32x8xf32, #tpu.memory_space<vmem>>, vector<1x1x32x8xf32>,
    return
  }
  func.func @transform_0(%arg0: i32, %arg1: i32) -> (i32, i32) {
    %c0_i32 = arith.constant 0 : i32
    %c0_i32_0 = arith.constant 0 : i32
    %c0_i32_1 = arith.constant 0 : i32
    return %c0_i32, %c0_i32_0 : i32, i32
  }
  func.func @transform_1(%arg0: i32, %arg1: i32) -> (i32, i32, i32) {
    %c0_i32 = arith.constant 0 : i32
    %c0_i32_0 = arith.constant 0 : i32
    return %arg0, %arg1, %c0_i32 : i32, i32, i32
  }
  func.func @transform_2(%arg0: i32, %arg1: i32) -> (i32, i32, i32, i32) {
    %c0_i32 = arith.constant 0 : i32
    %c0_i32_0 = arith.constant 0 : i32
    %c0_i32_1 = arith.constant 0 : i32
    return %arg0, %c0_i32, %arg1, %c0_i32_0 : i32, i32, i32, i32
  }
}

</mosaic_0001>

<bundles_post_ra>
// kernel: tpu_custom_call.1
= control target key start
LH: loop header
LB: loop body
LE: loop exit
PB: predicated region body
PF: predicated region fallthrough
CT: control target
= control target key end

     0   :  { %7 = vsyncpa [#allocation3], 0  ;;  %s2268_s0 = inlined_call_operand.hbm [shape: f32[16,16], index: 0, kind: input, shape index: {}]   ;;  %s2269_s1 = inlined_call_operand.hbm [shape: f32[2,32,32], index: 1, kind: input, shape index: {}]   ;;  %s2270_s2 = inlined_call_operand.vmem [shape: f32[2,4,32,8], index: 2, kind: output, shape index: {}]  }
   0x1   :  { %8 = vsyncpa [#allocation5], 0 }
   0x2   :  { %10 = vsyncpa [#allocation5 + $0x1], 0  ;;  %s2007_s9 = smov 0   ;;  %s2009_s10 = smov 0  }
   0x3   :  { %s2011_s11 = smov 0   ;;  %s2013_s12 = smov 0  }
   0x4   :  { %s2015_s13 = smov 0   ;;  %s2017_s14 = smov 0  }
   0x5 LB: > { %s1585_s15 = sadd.s32 4294967295, %s1984_s14   ;;  %p71_p0 = scmp.ne.s32.totalorder %s1968_s10, %s1964_s9  ;;  %s1984_s14 = sphi %s2017_s14, %s16_s14   ;;  %s1980_s13 = sphi %s2015_s13, %s2280_s13   ;;  %s1976_s12 = sphi %s2013_s12, %s2279_s12   ;;  %s1972_s11 = sphi %s2011_s11, %s2278_s11   ;;  %s1968_s10 = sphi %s2009_s10, %s2277_s10   ;;  %s1964_s9 = sphi %s2007_s9, %s2276_s9  }
   0x6   : > { %p2037_p1 = scmp.eq.s32.totalorder %s1585_s15, 0  ;;  %p1587_p2 = scmp.ge.s32.totalorder %s1984_s14, 1 }
   0x7   : > { %p110_p3 = scmp.lt.s32.totalorder %s1984_s14, 3  ;;  %s1986_s19 = smov [#allocation2]  }
   0x8   : > { %p2045_p4 = por %p2037_p1, %p71_p0  ;;  %s122_s20 = sshll.u32 %s1986_s19, 4  ;;  %s123_s20 = int_to_ptr.vmem [resolvable:$true] %s122_s20 }
   0x9   : > { %p2049_p5 = pnand %p1587_p2, %p110_p3  ;;  %s28_s22 = sadd.s32 1, %s1980_s13 }
   0xa   : > { %s1887_s23 = scalar_lea.vmem %s123_s20, 256  ;;  %p1895_p12 = scmp.lt.s32.totalorder %s123_s20, %s123_s20 }
   0xb   : > { %p1812_p6 = pneg %p2049_p5  ;;  %p1888_p9 = scmp.ne.s32.totalorder %s123_s20, %s1887_s23 }
   0xc   : > { %p1896_p13 = scmp.lt.s32.totalorder %s1887_s23, %s1887_s23 }
   0xd   : > { %p2057_p7 = pnand %p1812_p6, %p2037_p1 }
   0xe   : > { %p1897_p0 = por %p1896_p13, %p1895_p12 }
   0xf   : > { %p1878_p8 = pneg %p2057_p7 }
  0x11   : > { %p1890_p10 = pnand %p1888_p9, %p1878_p8 }
  0x13   : > { %p1891_p11 = pneg %p1890_p10 }
  0x15   : > { %p1898_p2 = pnand %p1897_p0, %p1891_p11 }
  0x17   : > { %1901 = shalt.err (!%p1898_p2)
}
  0x18   : > { %s1987_s24 = smov 128   ;;  %s1988_s25 = smov 8  }
  0x19   : > { %1815 = dma.hbm_to_vmem [thread:$0]  (!%p2057_p7), %s2268_s0, 256, %s123_s20, [#allocation3], %s1987_s24, %s1987_s24, %s1988_s25  }
  0x1a   : > { %p30_p3 = scmp.ge.s32.totalorder %s28_s22, 2  ;;  %s58_s28 = sadd.s32 1, %s1972_s11 }
  0x1b   : > { %p65_p6 = scmp.ne.s32.totalorder %s1972_s11, %s1968_s10  ;;  %p66_p8 = scmp.eq.s32.totalorder %s1984_s14, 0 }
  0x1c   : > { %s2282_s22 = smov (%p30_p3, %s28_s22), 0  ;;  %p1821_p10 = scmp.lt.s32.totalorder %s1984_s14, 2 }
  0x1d   : > { %p67_p9 = por %p66_p8, %p65_p6  ;;  %s53_s29 = ssub.s32 %s1980_s13, %s2282_s22 }
  0x1e   : > { %s136_s30 = sand.u32 1, %s1972_s11   ;;  %p56_p11 = scmp.eq.s32.totalorder %s53_s29, 0 }
  0x1f   : > { %s1590_s3 = sshll.u32 %s136_s30, 5  ;;  %s1612_s4 = sshll.u32 %s1980_s13, 9 }
  0x20   : > { %s2084_s5 = scalar_select %p56_p11, %s1972_s11, %s58_s28  }
  0x21   : > { %s148_s8 = scalar_lea.hbm %s2269_s1, %s1612_s4  ;;  %s140_s9 = scalar_lea.vmem [#allocation4], %s1590_s3 }
  0x22   : > { %s149_s15 = sshll.u32 %s140_s9, 4  ;;  %p2089_p7 = pnand %p1821_p10, %p67_p9  ;;  %s150_s15 = int_to_ptr.vmem [resolvable:$true] %s149_s15 }
  0x23   : > { %s137_s20 = scalar_lea.sflag [#allocation5], %s136_s30  ;;  %s1915_s21 = scalar_lea.vmem %s150_s15, 512 }
  0x24   : > { %p1904_p12 = pneg %p2089_p7  ;;  %p1916_p13 = scmp.ne.s32.totalorder %s150_s15, %s1915_s21 }
  0x25   : > { %s1989_s23 = smov [#allocation4]  }
  0x26   : > { %p1918_p0 = pnand %p1916_p13, %p1904_p12  ;;  %s1920_s26 = sshll.u32 %s1989_s23, 4  ;;  %s1921_s26 = int_to_ptr.vmem [resolvable:$false] %s1920_s26 }
  0x27   : > { %s1922_s27 = scalar_lea.vmem %s1921_s26, 1024  ;;  %p1923_p3 = scmp.lt.s32.totalorder %s150_s15, %s1921_s26 }
  0x28   : > { %p1919_p2 = pneg %p1918_p0  ;;  %p1924_p6 = scmp.lt.s32.totalorder %s1922_s27, %s1915_s21 }
  0x2a   : > { %p1925_p8 = por %p1924_p6, %p1923_p3 }
  0x2c   : > { %p1926_p9 = pnand %p1925_p8, %p1919_p2 }
  0x2e   : > { %1929 = shalt.err (!%p1926_p9)
}
  0x2f   : > { %1819 = dma.hbm_to_vmem [thread:$0]  (!%p2089_p7), %s148_s8, 512, %s150_s15, %s137_s20, %s1987_s24, %s1987_s24, %s1988_s25  }
  0x30   : > { %161 = sbr.rel (%p2049_p5) target bundleno = 525 (0x20d), region = 28 }
  0x35   : > { %1955 = dma.done.wait (%p2037_p1), [#allocation3], 256  }
  0x36   : > { %1957 = vsyncadd (%p2037_p1), [#allocation3], 4294967040  ;;  %s167_s28 = sand.u32 1, %s1968_s10  }
  0x37   : > { %s1595_s29 = sshll.u32 %s167_s28, 5  ;;  %s168_s30 = scalar_lea.sflag [#allocation5], %s167_s28 }
  0x38   : > { %s171_s3 = scalar_lea.vmem [#allocation4], %s1595_s29 }
  0x39   : > { %1959 = dma.done.wait (%p2045_p4), %s168_s30, 512  }
  0x3a   : > { %1961 = vsyncadd (%p2045_p4), %s168_s30, 4294966784  ;;  %vm213_vm0 = vcmask 130048   ;;  %v842_v0 = vld [vmem:[%s171_s3 + $0x10] sm:$0xff]  ;;  %v840_v1 = vld [vmem:[%s171_s3] sm:$0xff]  ;;  %s1990_s18 = smov 112   ;;  %p198_p1 = scmp.lt.s32.totalorder %s1976_s12, 1 }
  0x3b   : > { %v843_v2 = vld [vmem:[%s171_s3 + $0x18] sm:$0xff]  ;;  %852 = vrot.lane.b32.xlu1 %v842_v0, %s1990_s18  ;;  %848 = vrot.lane.b32.xlu0 %v840_v1, %s1990_s18  ;;  %v841_v3 = vld [vmem:[%s171_s3 + $0x8] sm:$0xff]  ;;  %v207_v5 = vld [vmem:[#allocation2] sm:$0xff]  ;;  %v215_v6 = vsel %vm213_vm0, %v840_v1, 0  ;;  %v221_v7 = vsel %vm213_vm0, %v842_v0, 0  ;;  %vm814_vm1 = vcmask 64512  }
  0x3c   : > { %v208_v4 = vld [vmem:[#allocation2 + $0x8] sm:$0xff]  ;;  %v224_v8 = vsel %vm213_vm0, %v843_v2, 0  ;;  %v2116_v10 = vand.u32 4294901760, %v207_v5  ;;  %v2118_v11 = vand.u32 4294901760, %v215_v6  ;;  %v218_v12 = vsel %vm213_vm0, %v841_v3, 0  ;;  %s2284_s12 = smov (!%p198_p1, %s1976_s12), 1 }
  0x3d   : > { %v2114_v9 = vand.u32 4294901760, %v208_v4  ;;  %v2121_v13 = vand.u32 4294901760, %v218_v12  ;;  %v2123_v14 = vand.u32 4294901760, %v221_v7  ;;  %v2125_v15 = vand.u32 4294901760, %v224_v8  ;;  %s1613_s16 = sshll.u32 %s2284_s12, 7  ;;  %s1991_s12 = smov 120  }
  0x3e   : > { %v294_v17 = vsub.f32 %v215_v6, %v2118_v11  ;;  %v2133_v18 = vsub.f32 %v207_v5, %v2116_v10  ;;  %1700 = vmatprep.mubr.f32.mxu1 %v2118_v11  ;;  %s2208_s25 = scalar_lea.vmem %s2270_s2, %s1613_s16 }
  0x3f   : > { %1686 = vmatprep.subr.mxu0 %v2114_v9  ;;  %v2129_v16 = vsub.f32 %v208_v4, %v2114_v9  ;;  %854 = vrot.lane.b32.xlu1 %v843_v2, %s1990_s18  ;;  %v304_v19 = vsub.f32 %v218_v12, %v2121_v13  ;;  %v314_v20 = vsub.f32 %v221_v7, %v2123_v14 }
  0x40   : > { %850 = vrot.lane.b32.xlu0 %v841_v3, %s1990_s18  ;;  %v324_v21 = vsub.f32 %v224_v8, %v2125_v15  ;;  %1687 = vmatpush3.msra.mxu0 %v2114_v9  ;;  %v295_v23 = vand.u32 4294901760, %v294_v17  ;;  %v2144_v24 = vand.u32 4294901760, %v2133_v18 }
  0x41   : > { %v2141_v22 = vand.u32 4294901760, %v2129_v16  ;;  %1688 = vmatprep.subr.mxu0 %v2116_v10  ;;  %v305_v25 = vand.u32 4294901760, %v304_v19  ;;  %v315_v26 = vand.u32 4294901760, %v314_v20 }
  0x42   : > { %v325_v27 = vand.u32 4294901760, %v324_v21  ;;  %1689 = vmatpush3.msra.mxu0 %v2116_v10  ;;  %v296_v29 = vsub.f32 %v294_v17, %v295_v23  ;;  %v372_v30 = vsub.f32 %v2133_v18, %v2144_v24 }
  0x43   : > { %v365_v28 = vsub.f32 %v2129_v16, %v2141_v22  ;;  %v306_v31 = vsub.f32 %v304_v19, %v305_v25  ;;  %v316_v32 = vsub.f32 %v314_v20, %v315_v26  ;;  %1706 = vmatprep.subr.mxu0 %v2129_v16 }
  0x44   : > { %v326_v33 = vsub.f32 %v324_v21, %v325_v27  ;;  %v297_v35 = vand.u32 4294901760, %v296_v29  ;;  %v373_v36 = vand.u32 4294901760, %v372_v30 }
  0x45   : > { %v366_v34 = vand.u32 4294901760, %v365_v28  ;;  %v307_v37 = vand.u32 4294901760, %v306_v31  ;;  %v317_v38 = vand.u32 4294901760, %v316_v32 }
  0x46   : > { %1690 = vmatprep.mubr.f32.mxu0 %v297_v35  ;;  %v327_v39 = vand.u32 4294901760, %v326_v33 }
  0x47   : > { %1696 = vmatprep.subr.mxu1 %v366_v34  ;;  %1691 = vmatmul.mubr.f32.vlgmr.msra.gmra.mxu0 %v307_v37 }
  0x48   : > { %1697 = vmatpush3.msra.mxu1 %v366_v34  ;;  %1693 = vmatprep.mubr.f32.mxu0 %v317_v38 }
  0x49   : > { %1698 = vmatprep.subr.mxu1 %v373_v36  ;;  %1707 = vmatpush3.msra.mxu0 %v2129_v16 }
  0x4a   : > { %1699 = vmatpush3.msra.mxu1 %v373_v36  ;;  %1708 = vmatprep.subr.mxu0 %v2133_v18 }
  0x4b   : > { %1701 = vmatmul.mubr.f32.vlgmr.msra.gmra.mxu1 %v2121_v13  ;;  %1694 = vmatmul.mubr.f32.gmra.mxu0 %v327_v39 }
  0x4c   : > { %1703 = vmatprep.mubr.f32.mxu1 %v2123_v14  ;;  %1716 = vmatprep.subr.mxu1 %v2114_v9 }
  0x4d   : > { %1709 = vmatpush3.msra.mxu0 %v2133_v18  ;;  %1710 = vmatprep.mubr.f32.mxu0 %v294_v17 }
  0x4e   : > { %1717 = vmatpush3.msra.mxu1 %v2114_v9  ;;  %1726 = vmatprep.subr.mxu0 %v2141_v22 }
  0x4f   : > { %1704 = vmatmul.mubr.f32.gmra.mxu1 %v2125_v15  ;;  %1718 = vmatprep.subr.mxu1 %v2116_v10 }
  0x50   : > { %1711 = vmatmul.mubr.f32.vlgmr.msra.gmra.mxu0 %v304_v19  ;;  %1719 = vmatpush3.msra.mxu1 %v2116_v10 }
  0x51   : > { %1720 = vmatprep.mubr.f32.mxu1 %v295_v23  ;;  %1713 = vmatprep.mubr.f32.mxu0 %v314_v20 }
  0x52   : > { %1736 = vmatprep.subr.mxu1 %v2114_v9  ;;  %1727 = vmatpush3.msra.mxu0 %v2141_v22 }
  0x53   : > { %1721 = vmatmul.mubr.f32.vlgmr.msra.gmra.mxu1 %v305_v25  ;;  %1728 = vmatprep.subr.mxu0 %v2144_v24 }
  0x54   : > { %1714 = vmatmul.mubr.f32.gmra.mxu0 %v324_v21  ;;  %1723 = vmatprep.mubr.f32.mxu1 %v315_v26 }
  0x55   : > { %1730 = vmatprep.mubr.f32.mxu0 %v2118_v11  ;;  %1729 = vmatpush3.msra.mxu0 %v2144_v24 }
  0x56   : > { %1737 = vmatpush3.msra.mxu1 %v2114_v9  ;;  %1746 = vmatprep.subr.mxu0 %v2114_v9 }
  0x57   : > { %1724 = vmatmul.mubr.f32.gmra.mxu1 %v325_v27  ;;  %1738 = vmatprep.subr.mxu1 %v2116_v10 }
  0x58   : > { %1731 = vmatmul.mubr.f32.vlgmr.msra.gmra.mxu0 %v2121_v13  ;;  %1739 = vmatpush3.msra.mxu1 %v2116_v10 }
  0x59   : > { %1740 = vmatprep.mubr.f32.mxu1 %v2118_v11  ;;  %1733 = vmatprep.mubr.f32.mxu0 %v2123_v14 }
  0x5a   : > { %1756 = vmatprep.subr.mxu1 %v366_v34  ;;  %1747 = vmatpush3.msra.mxu0 %v2114_v9 }
  0x5b   : > { %1741 = vmatmul.mubr.f32.vlgmr.msra.gmra.mxu1 %v2121_v13  ;;  %1748 = vmatprep.subr.mxu0 %v2116_v10 }
  0x5c   : > { %1734 = vmatmul.mubr.f32.gmra.mxu0 %v2125_v15  ;;  %1743 = vmatprep.mubr.f32.mxu1 %v2123_v14 }
  0x5d   : > { %1757 = vmatpush3.msra.mxu1 %v366_v34  ;;  %1749 = vmatpush3.msra.mxu0 %v2116_v10 }
  0x5e   : > { %1758 = vmatprep.subr.mxu1 %v373_v36  ;;  %1766 = vmatprep.subr.mxu0 %v2129_v16 }
  0x5f   : > { %1744 = vmatmul.mubr.f32.gmra.mxu1 %v2125_v15 }
  0x60   : > { %1759 = vmatpush3.msra.mxu1 %v373_v36 }
  0x61   : > { %1776 = vmatprep.subr.mxu1 %v2114_v9 }
  0xad   : > { %v853_v40 = vpop.permute.xlu1 %852  ;;  %v849_v41 = vpop.permute.xlu0 %848 }
  0xae   : > { %v860_v42 = vsel %vm213_vm0, %v853_v40, 0  ;;  %v856_v43 = vsel %vm213_vm0, %v849_v41, 0 }
  0xaf   : > { %v951_v44 = vand.u32 4294901760, %v860_v42  ;;  %v931_v45 = vand.u32 4294901760, %v856_v43 }
  0xb1   : > { %v952_v46 = vsub.f32 %v860_v42, %v951_v44  ;;  %v932_v47 = vsub.f32 %v856_v43, %v931_v45  ;;  %v855_v48 = vpop.permute.xlu1 %854  ;;  %1760 = vmatprep.mubr.f32.mxu1 %v931_v45 }
  0xb2   : > { %v851_v49 = vpop.permute.xlu0 %850  ;;  %v862_v50 = vsel %vm213_vm0, %v855_v48, 0 }
  0xb3   : > { %v858_v51 = vsel %vm213_vm0, %v851_v49, 0  ;;  %v933_v52 = vand.u32 4294901760, %v932_v47  ;;  %v961_v53 = vand.u32 4294901760, %v862_v50  ;;  %v953_v55 = vand.u32 4294901760, %v952_v46 }
  0xb4   : > { %v941_v54 = vand.u32 4294901760, %v858_v51 }
  0xb5   : > { %v962_v56 = vsub.f32 %v862_v50, %v961_v53  ;;  %v934_v58 = vsub.f32 %v932_v47, %v933_v52  ;;  %v954_v62 = vsub.f32 %v952_v46, %v953_v55 }
  0xb6   : > { %v942_v57 = vsub.f32 %v858_v51, %v941_v54  ;;  %1761 = vmatmul.mubr.f32.vlgmr.msra.gmra.mxu1 %v941_v54 }
  0xb7   : > { %1763 = vmatprep.mubr.f32.mxu1 %v951_v44  ;;  %1777 = vmatpush3.msra.mxu1 %v2114_v9  ;;  %v963_v59 = vand.u32 4294901760, %v962_v56  ;;  %v935_v61 = vand.u32 4294901760, %v934_v58  ;;  %v955_v2 = vand.u32 4294901760, %v954_v62 }
  0xb8   : > { %v943_v60 = vand.u32 4294901760, %v942_v57  ;;  %1778 = vmatprep.subr.mxu1 %v2116_v10 }
  0xb9   : > { %1779 = vmatpush3.msra.mxu1 %v2116_v10  ;;  %1750 = vmatprep.mubr.f32.mxu0 %v935_v61  ;;  %v964_v1 = vsub.f32 %v962_v56, %v963_v59 }
  0xba   : > { %v944_v63 = vsub.f32 %v942_v57, %v943_v60  ;;  %1764 = vmatmul.mubr.f32.gmra.mxu1 %v961_v53  ;;  %1796 = vmatprep.subr.mxu1 %v2114_v9 }
  0xbb   : > { %1780 = vmatprep.mubr.f32.mxu1 %v933_v52  ;;  %v965_v3 = vand.u32 4294901760, %v964_v1 }
  0xbc   : > { %v945_v0 = vand.u32 4294901760, %v944_v63 }
  0xbe   : > { %1751 = vmatmul.mubr.f32.vlgmr.msra.gmra.mxu0 %v945_v0  ;;  %1781 = vmatmul.mubr.f32.vlgmr.msra.gmra.mxu1 %v943_v60 }
  0xbf   : > { %1767 = vmatpush3.msra.mxu0 %v2129_v16  ;;  %1753 = vmatprep.mubr.f32.mxu0 %v955_v2 }
  0xc0   : > { %1783 = vmatprep.mubr.f32.mxu1 %v953_v55  ;;  %1768 = vmatprep.subr.mxu0 %v2133_v18 }
  0xc1   : > { %1769 = vmatpush3.msra.mxu0 %v2133_v18  ;;  %1797 = vmatpush3.msra.mxu1 %v2114_v9 }
  0xc2   : > { %1754 = vmatmul.mubr.f32.gmra.mxu0 %v965_v3  ;;  %1784 = vmatmul.mubr.f32.gmra.mxu1 %v963_v59 }
  0xc3   : > { %1770 = vmatprep.mubr.f32.mxu0 %v932_v47  ;;  %1800 = vmatprep.mubr.f32.mxu1 %v931_v45 }
  0xc4   : > { %1798 = vmatprep.subr.mxu1 %v2116_v10  ;;  %1786 = vmatprep.subr.mxu0 %v2141_v22 }
  0xc5   : > { %1799 = vmatpush3.msra.mxu1 %v2116_v10 }
  0xc6   : > { %1771 = vmatmul.mubr.f32.vlgmr.msra.gmra.mxu0 %v942_v57  ;;  %1801 = vmatmul.mubr.f32.vlgmr.msra.gmra.mxu1 %v941_v54 }
  0xc7   : > { %1787 = vmatpush3.msra.mxu0 %v2141_v22  ;;  %1773 = vmatprep.mubr.f32.mxu0 %v952_v46 }
  0xc8   : > { %1803 = vmatprep.mubr.f32.mxu1 %v951_v44  ;;  %1788 = vmatprep.subr.mxu0 %v2144_v24 }
  0xc9   : > { %1789 = vmatpush3.msra.mxu0 %v2144_v24 }
  0xca   : > { %1774 = vmatmul.mubr.f32.gmra.mxu0 %v962_v56  ;;  %1804 = vmatmul.mubr.f32.gmra.mxu1 %v961_v53 }
  0xcb   : > { %1790 = vmatprep.mubr.f32.mxu0 %v931_v45 }
  0xce   : > { %1791 = vmatmul.mubr.f32.vlgmr.msra.gmra.mxu0 %v941_v54 }
  0xcf   : > { %1793 = vmatprep.mubr.f32.mxu0 %v951_v44 }
  0xd2   : > { %1794 = vmatmul.mubr.f32.gmra.mxu0 %v961_v53 }
 0x107   : > { %v1692_v4 = vpop.f32.mrf.mxu0 }
 0x109   : > { %v299_v5 = vpop.f32.mrf.mxu0 }
 0x10b   : > { %v1702_v6 = vpop.f32.mrf.mxu1  ;;  %v1695_v7 = vpop.f32.mrf.mxu0 }
 0x10c   : > { %v417_v8 = vadd.f32 %v1702_v6, %v1692_v4 }
 0x10d   : > { %v410_v9 = vpop.f32.mrf.mxu1  ;;  %v319_v10 = vpop.f32.mrf.mxu0 }
 0x10e   : > { %v411_v11 = vadd.f32 %v410_v9, %v299_v5 }
 0x10f   : > { %v1705_v12 = vpop.f32.mrf.mxu1 }
 0x110   : > { %v1712_v13 = vpop.f32.mrf.mxu0  ;;  %v429_v14 = vadd.f32 %v1705_v12, %v1695_v7 }
 0x111   : > { %v422_v15 = vpop.f32.mrf.mxu1  ;;  %v512_v16 = vadd.f32 %v1712_v13, %v417_v8 }
 0x112   : > { %v504_v17 = vpop.f32.mrf.mxu0  ;;  %v423_v18 = vadd.f32 %v422_v15, %v319_v10 }
 0x113   : > { %v505_v19 = vadd.f32 %v504_v17, %v411_v11  ;;  %v1722_v20 = vpop.f32.mrf.mxu1 }
 0x114   : > { %v1715_v21 = vpop.f32.mrf.mxu0  ;;  %v609_v22 = vadd.f32 %v1722_v20, %v512_v16 }
 0x115   : > { %v526_v23 = vadd.f32 %v1715_v21, %v429_v14  ;;  %v600_v24 = vpop.f32.mrf.mxu1 }
 0x116   : > { %v518_v25 = vpop.f32.mrf.mxu0  ;;  %v601_v26 = vadd.f32 %v600_v24, %v505_v19 }
 0x117   : > { %v519_v27 = vadd.f32 %v518_v25, %v423_v18  ;;  %v1725_v28 = vpop.f32.mrf.mxu1 }
 0x118   : > { %v1732_v29 = vpop.f32.mrf.mxu0  ;;  %v625_v30 = vadd.f32 %v1725_v28, %v526_v23 }
 0x119   : > { %v616_v31 = vpop.f32.mrf.mxu1  ;;  %v708_v32 = vadd.f32 %v1732_v29, %v609_v22 }
 0x11a   : > { %v701_v33 = vpop.f32.mrf.mxu0  ;;  %v617_v34 = vadd.f32 %v616_v31, %v519_v27 }
 0x11b   : > { %v702_v35 = vadd.f32 %v701_v33, %v601_v26  ;;  %v1742_v36 = vpop.f32.mrf.mxu1 }
 0x11c   : > { %v799_v37 = vadd.f32 %v1742_v36, %v708_v32  ;;  %v1735_v38 = vpop.f32.mrf.mxu0 }
 0x11d   : > { %v720_v39 = vadd.f32 %v1735_v38, %v625_v30  ;;  %v792_v40 = vpop.f32.mrf.mxu1 }
 0x11e   : > { %816 = vst.msk [vmem:[%s2208_s25 + $0x8] sm:$0xff] %vm814_vm1, %v799_v37  ;;  %v793_v41 = vadd.f32 %v792_v40, %v702_v35  ;;  %v713_v42 = vpop.f32.mrf.mxu0  ;;  %825 = vrot.lane.b32.xlu1 %v799_v37, %s1991_s12 }
 0x11f   : > { %v714_v43 = vadd.f32 %v713_v42, %v617_v34  ;;  %v1745_v44 = vpop.f32.mrf.mxu1 }
 0x120   : > { %815 = vst.msk [vmem:[%s2208_s25] sm:$0xff] %vm814_vm1, %v793_v41  ;;  %v811_v45 = vadd.f32 %v1745_v44, %v720_v39  ;;  %823 = vrot.lane.b32.xlu0 %v793_v41, %s1991_s12 }
 0x121   : > { %v804_v46 = vpop.f32.mrf.mxu1 }
 0x122   : > { %818 = vst.msk [vmem:[%s2208_s25 + $0x18] sm:$0xff] %vm814_vm1, %v811_v45  ;;  %v805_v47 = vadd.f32 %v804_v46, %v714_v43  ;;  %829 = vrot.lane.b32.xlu1 %v811_v45, %s1991_s12 }
 0x124   : > { %817 = vst.msk [vmem:[%s2208_s25 + $0x10] sm:$0xff] %vm814_vm1, %v805_v47  ;;  %827 = vrot.lane.b32.xlu0 %v805_v47, %s1991_s12 }
 0x176   : > { %v1762_v48 = vpop.f32.mrf.mxu1 }
 0x178   : > { %v1048_v49 = vpop.f32.mrf.mxu1 }
 0x17a   : > { %v1765_v50 = vpop.f32.mrf.mxu1 }
 0x17c   : > { %v1060_v51 = vpop.f32.mrf.mxu1 }
 0x17e   : > { %v1752_v52 = vpop.f32.mrf.mxu0  ;;  %v1782_v53 = vpop.f32.mrf.mxu1 }
 0x17f   : > { %v1055_v61 = vadd.f32 %v1762_v48, %v1752_v52 }
 0x180   : > { %v937_v54 = vpop.f32.mrf.mxu0  ;;  %v1238_v55 = vpop.f32.mrf.mxu1 }
 0x181   : > { %v1049_v63 = vadd.f32 %v1048_v49, %v937_v54 }
 0x182   : > { %v1755_v56 = vpop.f32.mrf.mxu0  ;;  %v1785_v57 = vpop.f32.mrf.mxu1 }
 0x183   : > { %v1067_v3 = vadd.f32 %v1765_v50, %v1755_v56 }
 0x184   : > { %v957_v58 = vpop.f32.mrf.mxu0  ;;  %v1254_v59 = vpop.f32.mrf.mxu1 }
 0x185   : > { %v1061_v6 = vadd.f32 %v1060_v51, %v957_v58 }
 0x186   : > { %v1772_v60 = vpop.f32.mrf.mxu0  ;;  %v1802_v1 = vpop.f32.mrf.mxu1 }
 0x187   : > { %v1150_v0 = vadd.f32 %v1772_v60, %v1055_v61 }
 0x188   : > { %v1142_v62 = vpop.f32.mrf.mxu0  ;;  %v1430_v7 = vpop.f32.mrf.mxu1 }
 0x189   : > { %v1143_v4 = vadd.f32 %v1142_v62, %v1049_v63  ;;  %v1247_v9 = vadd.f32 %v1782_v53, %v1150_v0 }
 0x18a   : > { %v1775_v2 = vpop.f32.mrf.mxu0  ;;  %v1805_v16 = vpop.f32.mrf.mxu1 }
 0x18b   : > { %v1164_v8 = vadd.f32 %v1775_v2, %v1067_v3  ;;  %v1239_v13 = vadd.f32 %v1238_v55, %v1143_v4 }
 0x18c   : > { %v1156_v5 = vpop.f32.mrf.mxu0  ;;  %v1442_v29 = vpop.f32.mrf.mxu1 }
 0x18d   : > { %v1157_v11 = vadd.f32 %v1156_v5, %v1061_v6  ;;  %v1263_v19 = vadd.f32 %v1785_v57, %v1164_v8 }
 0x18e   : > { %v1792_v10 = vpop.f32.mrf.mxu0 }
 0x18f   : > { %v1346_v12 = vadd.f32 %v1792_v10, %v1247_v9  ;;  %v1255_v24 = vadd.f32 %v1254_v59, %v1157_v11 }
 0x190   : > { %v1339_v14 = vpop.f32.mrf.mxu0  ;;  %v826_v15 = vpop.permute.xlu1 %825 }
 0x191   : > { %v1437_v17 = vadd.f32 %v1802_v1, %v1346_v12  ;;  %v1340_v18 = vadd.f32 %v1339_v14, %v1239_v13  ;;  %1599 = vst.msk [vmem:[%s2208_s25 + $0x28] sm:$0xff] %vm814_vm1, %v826_v15 }
 0x192   : > { %v1795_v20 = vpop.f32.mrf.mxu0  ;;  %v824_v21 = vpop.permute.xlu0 %823 }
 0x193   : > { %1603 = vst.msk [vmem:[%s2208_s25 + $0x48] sm:$0xff] %vm814_vm1, %v1437_v17  ;;  %v1431_v22 = vadd.f32 %v1430_v7, %v1340_v18  ;;  %v1358_v23 = vadd.f32 %v1795_v20, %v1263_v19  ;;  %1463 = vrot.lane.b32.xlu1 %v1437_v17, %s1991_s12  ;;  %1598 = vst.msk [vmem:[%s2208_s25 + $0x20] sm:$0xff] %vm814_vm1, %v824_v21 }
 0x194   : > { %v1351_v25 = vpop.f32.mrf.mxu0  ;;  %v830_v26 = vpop.permute.xlu1 %829 }
 0x195   : > { %1602 = vst.msk [vmem:[%s2208_s25 + $0x40] sm:$0xff] %vm814_vm1, %v1431_v22  ;;  %v1449_v27 = vadd.f32 %v1805_v16, %v1358_v23  ;;  %v1352_v28 = vadd.f32 %v1351_v25, %v1255_v24  ;;  %1461 = vrot.lane.b32.xlu0 %v1431_v22, %s1991_s12  ;;  %1601 = vst.msk [vmem:[%s2208_s25 + $0x38] sm:$0xff] %vm814_vm1, %v830_v26 }
 0x196   : > { %v828_v30 = vpop.permute.xlu0 %827 }
 0x197   : > { %1605 = vst.msk [vmem:[%s2208_s25 + $0x58] sm:$0xff] %vm814_vm1, %v1449_v27  ;;  %v1443_v31 = vadd.f32 %v1442_v29, %v1352_v28  ;;  %1467 = vrot.lane.b32.xlu1 %v1449_v27, %s1991_s12  ;;  %1600 = vst.msk [vmem:[%s2208_s25 + $0x30] sm:$0xff] %vm814_vm1, %v828_v30 }
 0x199   : > { %1604 = vst.msk [vmem:[%s2208_s25 + $0x50] sm:$0xff] %vm814_vm1, %v1443_v31  ;;  %1465 = vrot.lane.b32.xlu0 %v1443_v31, %s1991_s12 }
 0x205   : > { %v1464_v32 = vpop.permute.xlu1 %1463 }
 0x206   : > { %1607 = vst.msk [vmem:[%s2208_s25 + $0x68] sm:$0xff] %vm814_vm1, %v1464_v32 }
 0x207   : > { %v1462_v33 = vpop.permute.xlu0 %1461 }
 0x208   : > { %1606 = vst.msk [vmem:[%s2208_s25 + $0x60] sm:$0xff] %vm814_vm1, %v1462_v33 }
 0x209   : > { %v1468_v34 = vpop.permute.xlu1 %1467 }
 0x20a   : > { %1609 = vst.msk [vmem:[%s2208_s25 + $0x78] sm:$0xff] %vm814_vm1, %v1468_v34 }
 0x20b   : > { %v1466_v35 = vpop.permute.xlu0 %1465 }
 0x20c   : > { %1608 = vst.msk [vmem:[%s2208_s25 + $0x70] sm:$0xff] %vm814_vm1, %v1466_v35 }
 0x20d PF: > { %s16_s14 = sadd.s32 1, %s1984_s14   ;;  %s2276_s9 = smov %s1968_s10 }
 0x20e   : > { %p13_p4 = scmp.ge.s32.totalorder %s16_s14, 4   ;;  %s2277_s10 = smov %s1972_s11 }
 0x20f   : > { %s2278_s11 = smov %s2084_s5  ;;  %s2279_s12 = smov %s1980_s13 }
 0x210   : > { %s2280_s13 = smov %s2282_s22  ;;  %15 = sbr.rel (!%p13_p4) target bundleno = 5 (0x5), region = 76 }
 0x215   :  { %1508 = vsyncpa [#allocation3], 1 }
 0x216   :  { %1510 = vsyncpa [#allocation3 + $0x1], 1 }
 0x217   :  { %1511 = vsyncpa [#allocation5], 1 }
 0x218   :  { %1513 = vsyncpa [#allocation5 + $0x1], 1 }

</bundles_post_ra>
